<compile_context>
chip_gen: v6e
topology: v6e:2x2x1
jax: 0.10.0
libtpu: 0.0.40
codegen_flags: <defaults>
</compile_context>

<pallas_src>
import functools
import math

import jax
import jax.numpy as jnp
from jax import lax
from jax.experimental import pallas as pl
from jax.experimental.pallas import tpu as pltpu

STAGES = 4
_LANE = 128
_MAX_TILE_ROWS = 128     # 128 rows x 128 lanes = 16384 samples DMA'd per grid step
_CHUNK_ROWS = 8          # 8 rows x 128 lanes = 1024 samples per inner compute chunk

_DIGAMMA_SHIFT = 2       # alp >= 1, S_alpha >= stages >= 1  =>  shifted arg >= 3

# Lanczos g=5, 7 coefficients (Numerical Recipes).  |err| < 2e-10 for z >= 1.
_LANCZOS_G = 5.0
_LANCZOS_COEFS = (
    1.000000000190015,
    76.18009172947146,
    -86.50532032941677,
    24.01409824083091,
    -1.231739572450155,
    0.1208650973866179e-2,
    -0.5395239384953e-5,
)
_N_LANCZOS = len(_LANCZOS_COEFS) - 1
_HALF_LOG_2PI = 0.5 * math.log(2.0 * math.pi)


# ---------------------------------------------------------------------------
# Polynomial precompute (Python doubles, once at import time).
# ---------------------------------------------------------------------------
def _poly_mul(a, b):
    out = [0.0] * (len(a) + len(b) - 1)
    for i, ai in enumerate(a):
        for j, bj in enumerate(b):
            out[i + j] += ai * bj
    return out


def _poly_scale_add(a, b, s):
    n = max(len(a), len(b))
    out = [0.0] * n
    for i, ai in enumerate(a):
        out[i] += ai
    for i, bi in enumerate(b):
        out[i] += s * bi
    return out


def _poly_from_offsets(offsets):
    """prod_j (x + offsets[j]), ascending coefficients."""
    p = [1.0]
    for o in offsets:
        p = _poly_mul(p, [float(o), 1.0])
    return p


# Lanczos sum  c0 + sum_i c_i/(w+i)  as a rational P(w)/Q(w) (one divide).
_LANCZOS_Q = _poly_from_offsets(range(1, _N_LANCZOS + 1))
_P = [_LANCZOS_COEFS[0] * cc for cc in _LANCZOS_Q]
for _i in range(1, _N_LANCZOS + 1):
    _Qi = _poly_from_offsets([j for j in range(1, _N_LANCZOS + 1) if j != _i])
    _P = _poly_scale_add(_P, _Qi, _LANCZOS_COEFS[_i])
_LANCZOS_P = tuple(_P)
_LANCZOS_Q = tuple(_LANCZOS_Q)


def _shift_polys(k):
    """R_k(x)=prod_{j=0..k-1}(x+j) and its derivative (for sum_j 1/(x+j))."""
    r = _poly_from_offsets(range(k))
    d = [r[i + 1] * (i + 1) for i in range(len(r) - 1)]
    return tuple(r), tuple(d)


def _horner(x, coefs):
    """Ascending-coefficient polynomial evaluation (VPU mul/add only)."""
    acc = jnp.full_like(x, coefs[-1])
    for cc in coefs[-2::-1]:
        acc = acc * x + cc
    return acc


# ---------------------------------------------------------------------------
# In-kernel special functions (positive arguments only).
# ---------------------------------------------------------------------------
def _lgamma_pos(z):
    """log Gamma(z) for z >= 1: Lanczos rational form, 1 divide + 2 logs."""
    w = z - 1.0
    t = w + _LANCZOS_G + 0.5
    acc = _horner(w, _LANCZOS_P) / _horner(w, _LANCZOS_Q)
    return _HALF_LOG_2PI + (w + 0.5) * jnp.log(t) - t + jnp.log(acc)


def _digamma_shifted(x, shifts):
    """digamma(x) for x >= 1 via `shifts` unconditional recurrence steps
    (rational form, 1 divide) plus the asymptotic series at y = x + shifts."""
    if shifts > 0:
        r_coefs, d_coefs = _shift_polys(shifts)
        corr = _horner(x, d_coefs) / _horner(x, r_coefs)   # sum_{j<shifts} 1/(x+j)
        y = x + float(shifts)
    else:
        corr = None
        y = x
    inv = 1.0 / y
    inv2 = inv * inv
    psi = (jnp.log(y) - 0.5 * inv
           - inv2 * (1.0 / 12.0
                     - inv2 * (1.0 / 120.0
                               - inv2 * (1.0 / 252.0 - inv2 * (1.0 / 240.0)))))
    return psi - corr if corr is not None else psi


def _csum(x, rows):
    """Class-dim reduction over the (leading) class axis as explicit adds."""
    total = x[0]
    for i in range(1, rows):
        total = total + x[i]
    return total


# ---------------------------------------------------------------------------
# Kernel
# ---------------------------------------------------------------------------
def _kl_loss_kernel(coef_ref, y_ref, alpha_ref, out_ref, *,
                    stages, true_n, chunk_rows, needs_mask):
    pid = pl.program_id(0)
    tile_rows = y_ref.shape[1]
    n_chunks = tile_rows // chunk_rows
    lnB_uni = -float(math.lgamma(float(stages)))
    coef = coef_ref[0]

    def chunk_body(c, acc):
        row0 = pl.multiple_of(c * chunk_rows, chunk_rows)
        y = y_ref[:, pl.ds(row0, chunk_rows), :]           # (stages, R, 128)
        alpha = alpha_ref[:, pl.ds(row0, chunk_rows), :]   # (stages, R, 128)

        # forward(): A + B ---------------------------------------------------
        S = _csum(alpha, stages)                           # (R, 128)
        inv_S = 1.0 / S
        m = alpha * inv_S
        A = _csum((y - m) ** 2, stages)
        B = _csum(alpha * (S - alpha), stages) * (inv_S * inv_S) / (S + 1.0)

        # kl_fun(alp) with beta = ones ----------------------------------------
        alp = alpha * (1.0 - y) + y                        # >= 1 elementwise
        S_a = _csum(alp, stages)                           # >= stages

        # One fully-dense special-function pass over {alp slabs, S_alpha slab}.
        stk = jnp.concatenate([alp, S_a[jnp.newaxis]], axis=0)   # (stages+1, R, 128)
        lg = _lgamma_pos(stk)
        dg = _digamma_shifted(stk, _DIGAMMA_SHIFT)

        lg_alp = _csum(lg[:stages], stages)
        wsum = _csum((alp - 1.0) * dg[:stages], stages)
        # sum_c (alp_c - 1)(dg1_c - dg0) = sum_c (alp_c-1) dg1_c - (S_a - stages) dg0
        kl = (wsum - (S_a - float(stages)) * dg[stages]
              + (lg[stages] - lg_alp) + lnB_uni)

        contrib = A + B + coef * kl                        # (R, 128)
        if needs_mask:
            rows = lax.broadcasted_iota(jnp.int32, contrib.shape, 0)
            lanes = lax.broadcasted_iota(jnp.int32, contrib.shape, 1)
            idx = (pid * tile_rows + row0 + rows) * _LANE + lanes
            contrib = jnp.where(idx < true_n, contrib, 0.0)
        return acc + contrib

    acc = lax.fori_loop(0, n_chunks, chunk_body,
                        jnp.zeros((chunk_rows, _LANE), jnp.float32))
    out_ref[...] = jnp.broadcast_to(jnp.sum(acc), out_ref.shape)


# ---------------------------------------------------------------------------
# Wrapper
# ---------------------------------------------------------------------------
def kl_loss(y_new, alpha, global_step, annealing_step, *, stages=STAGES):
    """Pallas implementation of Kl_loss(stage=stages).forward(...)."""
    n, c = y_new.shape
    assert alpha.shape == (n, c) and c == stages

    n_rows = int(pl.cdiv(n, _LANE))
    n_pad = n_rows * _LANE

    # (N, C) -> (C, n_rows, 128): classes lead, batch fills the (8,128) vreg.
    y_t = jnp.transpose(y_new).astype(jnp.float32)
    a_t = jnp.transpose(alpha).astype(jnp.float32)
    if n_pad != n:
        # Neutral padding (y=0, alpha=1) keeps padded lanes finite; they are
        # additionally masked out of the accumulation in-kernel.
        y_t = jnp.pad(y_t, ((0, 0), (0, n_pad - n)), constant_values=0.0)
        a_t = jnp.pad(a_t, ((0, 0), (0, n_pad - n)), constant_values=1.0)
    y3 = y_t.reshape(stages, n_rows, _LANE)
    a3 = a_t.reshape(stages, n_rows, _LANE)

    # Balanced tiling: pick the grid first, then round per-step rows to the
    # inner chunk so padded compute never approaches a whole tile.
    grid_n = max(1, int(pl.cdiv(n_rows, _MAX_TILE_ROWS)))
    per_rows = int(pl.cdiv(n_rows, grid_n))
    if per_rows <= _CHUNK_ROWS:
        tile_rows = per_rows            # single chunk == whole (full-dim) block
        chunk_rows = per_rows
    else:
        chunk_rows = _CHUNK_ROWS
        tile_rows = int(pl.cdiv(per_rows, _CHUNK_ROWS)) * _CHUNK_ROWS
    num_tiles = int(pl.cdiv(n_rows, tile_rows))

    # annealing_coef = min(1, global_step / annealing_step)
    coef = jnp.minimum(
        jnp.float32(1.0),
        jnp.asarray(global_step, jnp.float32) /
        jnp.asarray(annealing_step, jnp.float32))
    coef = jnp.reshape(coef.astype(jnp.float32), (1,))

    kernel = functools.partial(
        _kl_loss_kernel, stages=stages, true_n=n, chunk_rows=chunk_rows,
        needs_mask=(num_tiles * tile_rows * _LANE != n))

    partials = pl.pallas_call(
        kernel,
        out_shape=jax.ShapeDtypeStruct((num_tiles, 1, _LANE), jnp.float32),
        grid=(num_tiles,),
        in_specs=[
            pl.BlockSpec(memory_space=pltpu.SMEM),                         # [coef]
            pl.BlockSpec((stages, tile_rows, _LANE), lambda i: (0, i, 0)),  # y
            pl.BlockSpec((stages, tile_rows, _LANE), lambda i: (0, i, 0)),  # alpha
        ],
        out_specs=pl.BlockSpec((1, 1, _LANE), lambda i: (i, 0, 0)),
        compiler_params=pltpu.CompilerParams(
            dimension_semantics=("parallel",)),
    )(coef, y3, a3)

    # Tiny epilogue: combine the per-tile partial sums and apply 1/N.
    return jnp.sum(partials[:, 0, 0]) / jnp.float32(n)


# ---------------------------------------------------------------------------
# Pure-JAX reference (mirrors the PyTorch module)
# ---------------------------------------------------------------------------
def _kl_loss_ref(y_new, alpha, global_step, annealing_step, stages=STAGES):
    from jax.scipy.special import gammaln, digamma
    y_new = y_new.astype(jnp.float32)
    alpha = alpha.astype(jnp.float32)
    S = jnp.sum(alpha, axis=1, keepdims=True)
    m = alpha / S
    A = jnp.sum((y_new - m) ** 2, axis=1, keepdims=True)
    B = jnp.sum(alpha * (S - alpha) / (S * S * (S + 1.0)), axis=1, keepdims=True)
    coef = min(1.0, float(global_step) / float(annealing_step))
    alp = alpha * (1.0 - y_new) + y_new
    S_a = jnp.sum(alp, axis=1, keepdims=True)
    lnB = gammaln(S_a) - jnp.sum(gammaln(alp), axis=1, keepdims=True)
    lnB_uni = -gammaln(jnp.float32(stages))
    kl = (jnp.sum((alp - 1.0) * (digamma(alp) - digamma(S_a)),
                  axis=1, keepdims=True) + lnB + lnB_uni)
    return jnp.mean(A + B + coef * kl)


if __name__ == "__main__":
    key = jax.random.PRNGKey(0)
    k1, k2, k3, k4, k5, k6 = jax.random.split(key, 6)

    # Primary small case matching the module's expected use: (N, 4) inputs.
    N, C = 8, STAGES
    labels = jax.random.randint(k1, (N,), 0, C)
    y_a = jax.nn.one_hot(labels, C, dtype=jnp.float32)                  # (8, 4)
    alpha_a = jax.random.uniform(k2, (N, C), minval=0.0, maxval=5.0) + 1.0
    loss = jax.block_until_ready(kl_loss(y_a, alpha_a, 10, 50))
    ref = _kl_loss_ref(y_a, alpha_a, 10, 50)
    assert jnp.allclose(loss, ref, rtol=2e-3, atol=2e-3), (loss, ref)

    # Partial last 128-lane group (exercises the in-kernel mask path).
    N2 = 300
    labels_b = jax.random.randint(k3, (N2,), 0, C)
    y_b = jax.nn.one_hot(labels_b, C, dtype=jnp.float32)
    alpha_b = jax.random.uniform(k4, (N2, C), minval=0.0, maxval=5.0) + 1.0
    loss_b = jax.block_until_ready(kl_loss(y_b, alpha_b, 60, 50))
    ref_b = _kl_loss_ref(y_b, alpha_b, 60, 50)
    assert jnp.allclose(loss_b, ref_b, rtol=2e-3, atol=2e-3), (loss_b, ref_b)

    # Multi-chunk inner loop (2 chunks of 8 rows), no masking needed.
    N3 = 2048
    labels_c = jax.random.randint(k5, (N3,), 0, C)
    y_c = jax.nn.one_hot(labels_c, C, dtype=jnp.float32)
    alpha_c = jax.random.uniform(k6, (N3, C), minval=0.0, maxval=5.0) + 1.0
    loss_c = jax.block_until_ready(kl_loss(y_c, alpha_c, 25, 50))
    ref_c = _kl_loss_ref(y_c, alpha_c, 25, 50)
    assert jnp.allclose(loss_c, ref_c, rtol=2e-3, atol=2e-3), (loss_c, ref_c)

    print("KERNEL_OK")
</pallas_src>

<mosaic_0001>
module attributes {stable_mosaic.version = 11 : i64} {
  func.func @_kl_loss_kernel(%arg0: i32, %arg1: memref<1xf32, #tpu.memory_space<smem>>, %arg2: memref<4x1x128xf32, #tpu.memory_space<vmem>>, %arg3: memref<4x1x128xf32, #tpu.memory_space<vmem>>, %arg4: memref<1x1x128xf32, #tpu.memory_space<vmem>>) attributes {dimension_semantics = [#tpu.dimension_semantics<parallel>], iteration_bounds = array<i64: 1>, scalar_prefetch = 0 : i64, scratch_operands = 0 : i64, tpu.core_type = #tpu.core_type<tc>, window_params = [{transform_indices = @transform_0, window_bounds = array<i64: 1>}, {transform_indices = @transform_1, window_bounds = array<i64: 4, 1, 128>}, {transform_indices = @transform_2, window_bounds = array<i64: 4, 1, 128>}, {transform_indices = @transform_3, window_bounds = array<i64: 1, 1, 128>}]} {
    %c0 = arith.constant 0 : index
    %0 = memref.load %arg1[%c0] : memref<1xf32, #tpu.memory_space<smem>>
    %cst = arith.constant 0.000000e+00 : f32
    %1 = vector.broadcast %cst : f32 to vector<1x128xf32>
    %c0_i32 = arith.constant 0 : i32
    %c1_i32 = arith.constant 1 : i32
    %2 = arith.muli %c0_i32, %c1_i32 : i32
    %3 = tpu.assume_multiple %2, 1 : i32
    %c0_0 = arith.constant 0 : index
    %4 = arith.index_cast %3 : i32 to index
    %c0_1 = arith.constant 0 : index
    %5 = vector.load %arg2[%c0_0, %4, %c0_1] : memref<4x1x128xf32, #tpu.memory_space<vmem>>, vector<4x1x128xf32>
    %c0_2 = arith.constant 0 : index
    %6 = arith.index_cast %3 : i32 to index
    %c0_3 = arith.constant 0 : index
    %7 = vector.load %arg3[%c0_2, %6, %c0_3] : memref<4x1x128xf32, #tpu.memory_space<vmem>>, vector<4x1x128xf32>
    %8 = vector.extract_strided_slice %7 {offsets = [0, 0, 0], sizes = [1, 1, 128], strides = [1, 1, 1]} : vector<4x1x128xf32> to vector<1x1x128xf32>
    %9 = vector.shape_cast %8 : vector<1x1x128xf32> to vector<1x128xf32>
    %10 = vector.extract_strided_slice %7 {offsets = [1, 0, 0], sizes = [1, 1, 128], strides = [1, 1, 1]} : vector<4x1x128xf32> to vector<1x1x128xf32>
    %11 = vector.shape_cast %10 : vector<1x1x128xf32> to vector<1x128xf32>
    %12 = arith.addf %9, %11 : vector<1x128xf32>
    %13 = vector.extract_strided_slice %7 {offsets = [2, 0, 0], sizes = [1, 1, 128], strides = [1, 1, 1]} : vector<4x1x128xf32> to vector<1x1x128xf32>
    %14 = vector.shape_cast %13 : vector<1x1x128xf32> to vector<1x128xf32>
    %15 = arith.addf %12, %14 : vector<1x128xf32>
    %16 = vector.extract_strided_slice %7 {offsets = [3, 0, 0], sizes = [1, 1, 128], strides = [1, 1, 1]} : vector<4x1x128xf32> to vector<1x1x128xf32>
    %17 = vector.shape_cast %16 : vector<1x1x128xf32> to vector<1x128xf32>
    %18 = arith.addf %15, %17 : vector<1x128xf32>
    %cst_4 = arith.constant 1.000000e+00 : f32
    %19 = vector.broadcast %cst_4 : f32 to vector<1x128xf32>
    %20 = arith.divf %19, %18 : vector<1x128xf32>
    %21 = vector.shape_cast %20 : vector<1x128xf32> to vector<1x1x128xf32>
    %22 = vector.broadcast %21 : vector<1x1x128xf32> to vector<4x1x128xf32>
    %23 = arith.mulf %7, %22 : vector<4x1x128xf32>
    %24 = arith.subf %5, %23 : vector<4x1x128xf32>
    %25 = arith.mulf %24, %24 : vector<4x1x128xf32>
    %26 = vector.extract_strided_slice %25 {offsets = [0, 0, 0], sizes = [1, 1, 128], strides = [1, 1, 1]} : vector<4x1x128xf32> to vector<1x1x128xf32>
    %27 = vector.shape_cast %26 : vector<1x1x128xf32> to vector<1x128xf32>
    %28 = vector.extract_strided_slice %25 {offsets = [1, 0, 0], sizes = [1, 1, 128], strides = [1, 1, 1]} : vector<4x1x128xf32> to vector<1x1x128xf32>
    %29 = vector.shape_cast %28 : vector<1x1x128xf32> to vector<1x128xf32>
    %30 = arith.addf %27, %29 : vector<1x128xf32>
    %31 = vector.extract_strided_slice %25 {offsets = [2, 0, 0], sizes = [1, 1, 128], strides = [1, 1, 1]} : vector<4x1x128xf32> to vector<1x1x128xf32>
    %32 = vector.shape_cast %31 : vector<1x1x128xf32> to vector<1x128xf32>
    %33 = arith.addf %30, %32 : vector<1x128xf32>
    %34 = vector.extract_strided_slice %25 {offsets = [3, 0, 0], sizes = [1, 1, 128], strides = [1, 1, 1]} : vector<4x1x128xf32> to vector<1x1x128xf32>
    %35 = vector.shape_cast %34 : vector<1x1x128xf32> to vector<1x128xf32>
    %36 = arith.addf %33, %35 : vector<1x128xf32>
    %37 = vector.shape_cast %18 : vector<1x128xf32> to vector<1x1x128xf32>
    %38 = vector.broadcast %37 : vector<1x1x128xf32> to vector<4x1x128xf32>
    %39 = arith.subf %38, %7 : vector<4x1x128xf32>
    %40 = arith.mulf %7, %39 : vector<4x1x128xf32>
    %41 = vector.extract_strided_slice %40 {offsets = [0, 0, 0], sizes = [1, 1, 128], strides = [1, 1, 1]} : vector<4x1x128xf32> to vector<1x1x128xf32>
    %42 = vector.shape_cast %41 : vector<1x1x128xf32> to vector<1x128xf32>
    %43 = vector.extract_strided_slice %40 {offsets = [1, 0, 0], sizes = [1, 1, 128], strides = [1, 1, 1]} : vector<4x1x128xf32> to vector<1x1x128xf32>
    %44 = vector.shape_cast %43 : vector<1x1x128xf32> to vector<1x128xf32>
    %45 = arith.addf %42, %44 : vector<1x128xf32>
    %46 = vector.extract_strided_slice %40 {offsets = [2, 0, 0], sizes = [1, 1, 128], strides = [1, 1, 1]} : vector<4x1x128xf32> to vector<1x1x128xf32>
    %47 = vector.shape_cast %46 : vector<1x1x128xf32> to vector<1x128xf32>
    %48 = arith.addf %45, %47 : vector<1x128xf32>
    %49 = vector.extract_strided_slice %40 {offsets = [3, 0, 0], sizes = [1, 1, 128], strides = [1, 1, 1]} : vector<4x1x128xf32> to vector<1x1x128xf32>
    %50 = vector.shape_cast %49 : vector<1x1x128xf32> to vector<1x128xf32>
    %51 = arith.addf %48, %50 : vector<1x128xf32>
    %52 = arith.mulf %20, %20 : vector<1x128xf32>
    %53 = arith.mulf %51, %52 : vector<1x128xf32>
    %cst_5 = arith.constant 1.000000e+00 : f32
    %54 = vector.broadcast %cst_5 : f32 to vector<1x128xf32>
    %55 = arith.addf %18, %54 : vector<1x128xf32>
    %56 = arith.divf %53, %55 : vector<1x128xf32>
    %cst_6 = arith.constant 1.000000e+00 : f32
    %57 = vector.broadcast %cst_6 : f32 to vector<4x1x128xf32>
    %58 = arith.subf %57, %5 : vector<4x1x128xf32>
    %59 = arith.mulf %7, %58 : vector<4x1x128xf32>
    %60 = arith.addf %59, %5 : vector<4x1x128xf32>
    %61 = vector.extract_strided_slice %60 {offsets = [0, 0, 0], sizes = [1, 1, 128], strides = [1, 1, 1]} : vector<4x1x128xf32> to vector<1x1x128xf32>
    %62 = vector.shape_cast %61 : vector<1x1x128xf32> to vector<1x128xf32>
    %63 = vector.extract_strided_slice %60 {offsets = [1, 0, 0], sizes = [1, 1, 128], strides = [1, 1, 1]} : vector<4x1x128xf32> to vector<1x1x128xf32>
    %64 = vector.shape_cast %63 : vector<1x1x128xf32> to vector<1x128xf32>
    %65 = arith.addf %62, %64 : vector<1x128xf32>
    %66 = vector.extract_strided_slice %60 {offsets = [2, 0, 0], sizes = [1, 1, 128], strides = [1, 1, 1]} : vector<4x1x128xf32> to vector<1x1x128xf32>
    %67 = vector.shape_cast %66 : vector<1x1x128xf32> to vector<1x128xf32>
    %68 = arith.addf %65, %67 : vector<1x128xf32>
    %69 = vector.extract_strided_slice %60 {offsets = [3, 0, 0], sizes = [1, 1, 128], strides = [1, 1, 1]} : vector<4x1x128xf32> to vector<1x1x128xf32>
    %70 = vector.shape_cast %69 : vector<1x1x128xf32> to vector<1x128xf32>
    %71 = arith.addf %68, %70 : vector<1x128xf32>
    %72 = vector.shape_cast %71 : vector<1x128xf32> to vector<1x1x128xf32>
    %73 = tpu.concatenate %60, %72 in 0 : vector<4x1x128xf32>, vector<1x1x128xf32> -> vector<5x1x128xf32>
    %cst_7 = arith.constant 1.000000e+00 : f32
    %74 = vector.broadcast %cst_7 : f32 to vector<5x1x128xf32>
    %75 = arith.subf %73, %74 : vector<5x1x128xf32>
    %cst_8 = arith.constant 5.000000e+00 : f32
    %76 = vector.broadcast %cst_8 : f32 to vector<5x1x128xf32>
    %77 = arith.addf %75, %76 : vector<5x1x128xf32>
    %cst_9 = arith.constant 5.000000e-01 : f32
    %78 = vector.broadcast %cst_9 : f32 to vector<5x1x128xf32>
    %79 = arith.addf %77, %78 : vector<5x1x128xf32>
    %cst_10 = arith.constant 1.000000e+00 : f32
    %80 = vector.broadcast %cst_10 : f32 to vector<5x1x128xf32>
    %81 = arith.mulf %80, %75 : vector<5x1x128xf32>
    %cst_11 = arith.constant 33.4583321 : f32
    %82 = vector.broadcast %cst_11 : f32 to vector<5x1x128xf32>
    %83 = arith.addf %81, %82 : vector<5x1x128xf32>
    %84 = arith.mulf %83, %75 : vector<5x1x128xf32>
    %cst_12 = arith.constant 466.334198 : f32
    %85 = vector.broadcast %cst_12 : f32 to vector<5x1x128xf32>
    %86 = arith.addf %84, %85 : vector<5x1x128xf32>
    %87 = arith.mulf %86, %75 : vector<5x1x128xf32>
    %cst_13 = arith.constant 3465.70947 : f32
    %88 = vector.broadcast %cst_13 : f32 to vector<5x1x128xf32>
    %89 = arith.addf %87, %88 : vector<5x1x128xf32>
    %90 = arith.mulf %89, %75 : vector<5x1x128xf32>
    %cst_14 = arith.constant 14484.9141 : f32
    %91 = vector.broadcast %cst_14 : f32 to vector<5x1x128xf32>
    %92 = arith.addf %90, %91 : vector<5x1x128xf32>
    %93 = arith.mulf %92, %75 : vector<5x1x128xf32>
    %cst_15 = arith.constant 32281.0645 : f32
    %94 = vector.broadcast %cst_15 : f32 to vector<5x1x128xf32>
    %95 = arith.addf %93, %94 : vector<5x1x128xf32>
    %96 = arith.mulf %95, %75 : vector<5x1x128xf32>
    %cst_16 = arith.constant 29969.5938 : f32
    %97 = vector.broadcast %cst_16 : f32 to vector<5x1x128xf32>
    %98 = arith.addf %96, %97 : vector<5x1x128xf32>
    %cst_17 = arith.constant 1.000000e+00 : f32
    %99 = vector.broadcast %cst_17 : f32 to vector<5x1x128xf32>
    %100 = arith.mulf %99, %75 : vector<5x1x128xf32>
    %cst_18 = arith.constant 2.100000e+01 : f32
    %101 = vector.broadcast %cst_18 : f32 to vector<5x1x128xf32>
    %102 = arith.addf %100, %101 : vector<5x1x128xf32>
    %103 = arith.mulf %102, %75 : vector<5x1x128xf32>
    %cst_19 = arith.constant 1.750000e+02 : f32
    %104 = vector.broadcast %cst_19 : f32 to vector<5x1x128xf32>
    %105 = arith.addf %103, %104 : vector<5x1x128xf32>
    %106 = arith.mulf %105, %75 : vector<5x1x128xf32>
    %cst_20 = arith.constant 7.350000e+02 : f32
    %107 = vector.broadcast %cst_20 : f32 to vector<5x1x128xf32>
    %108 = arith.addf %106, %107 : vector<5x1x128xf32>
    %109 = arith.mulf %108, %75 : vector<5x1x128xf32>
    %cst_21 = arith.constant 1.624000e+03 : f32
    %110 = vector.broadcast %cst_21 : f32 to vector<5x1x128xf32>
    %111 = arith.addf %109, %110 : vector<5x1x128xf32>
    %112 = arith.mulf %111, %75 : vector<5x1x128xf32>
    %cst_22 = arith.constant 1.764000e+03 : f32
    %113 = vector.broadcast %cst_22 : f32 to vector<5x1x128xf32>
    %114 = arith.addf %112, %113 : vector<5x1x128xf32>
    %115 = arith.mulf %114, %75 : vector<5x1x128xf32>
    %cst_23 = arith.constant 7.200000e+02 : f32
    %116 = vector.broadcast %cst_23 : f32 to vector<5x1x128xf32>
    %117 = arith.addf %115, %116 : vector<5x1x128xf32>
    %118 = arith.divf %98, %117 : vector<5x1x128xf32>
    %cst_24 = arith.constant 5.000000e-01 : f32
    %119 = vector.broadcast %cst_24 : f32 to vector<5x1x128xf32>
    %120 = arith.addf %75, %119 : vector<5x1x128xf32>
    %121 = math.log %79 : vector<5x1x128xf32>
    %122 = arith.mulf %120, %121 : vector<5x1x128xf32>
    %cst_25 = arith.constant 0.918938517 : f32
    %123 = vector.broadcast %cst_25 : f32 to vector<5x1x128xf32>
    %124 = arith.addf %123, %122 : vector<5x1x128xf32>
    %125 = arith.subf %124, %79 : vector<5x1x128xf32>
    %126 = math.log %118 : vector<5x1x128xf32>
    %127 = arith.addf %125, %126 : vector<5x1x128xf32>
    %cst_26 = arith.constant 2.000000e+00 : f32
    %128 = vector.broadcast %cst_26 : f32 to vector<5x1x128xf32>
    %129 = arith.mulf %128, %73 : vector<5x1x128xf32>
    %cst_27 = arith.constant 1.000000e+00 : f32
    %130 = vector.broadcast %cst_27 : f32 to vector<5x1x128xf32>
    %131 = arith.addf %129, %130 : vector<5x1x128xf32>
    %cst_28 = arith.constant 1.000000e+00 : f32
    %132 = vector.broadcast %cst_28 : f32 to vector<5x1x128xf32>
    %133 = arith.mulf %132, %73 : vector<5x1x128xf32>
    %cst_29 = arith.constant 1.000000e+00 : f32
    %134 = vector.broadcast %cst_29 : f32 to vector<5x1x128xf32>
    %135 = arith.addf %133, %134 : vector<5x1x128xf32>
    %136 = arith.mulf %135, %73 : vector<5x1x128xf32>
    %cst_30 = arith.constant 0.000000e+00 : f32
    %137 = vector.broadcast %cst_30 : f32 to vector<5x1x128xf32>
    %138 = arith.addf %136, %137 : vector<5x1x128xf32>
    %139 = arith.divf %131, %138 : vector<5x1x128xf32>
    %cst_31 = arith.constant 2.000000e+00 : f32
    %140 = vector.broadcast %cst_31 : f32 to vector<5x1x128xf32>
    %141 = arith.addf %73, %140 : vector<5x1x128xf32>
    %cst_32 = arith.constant 1.000000e+00 : f32
    %142 = vector.broadcast %cst_32 : f32 to vector<5x1x128xf32>
    %143 = arith.divf %142, %141 : vector<5x1x128xf32>
    %144 = arith.mulf %143, %143 : vector<5x1x128xf32>
    %145 = math.log %141 : vector<5x1x128xf32>
    %cst_33 = arith.constant 5.000000e-01 : f32
    %146 = vector.broadcast %cst_33 : f32 to vector<5x1x128xf32>
    %147 = arith.mulf %146, %143 : vector<5x1x128xf32>
    %148 = arith.subf %145, %147 : vector<5x1x128xf32>
    %cst_34 = arith.constant 0.00416666688 : f32
    %149 = vector.broadcast %cst_34 : f32 to vector<5x1x128xf32>
    %150 = arith.mulf %144, %149 : vector<5x1x128xf32>
    %cst_35 = arith.constant 0.0039682542 : f32
    %151 = vector.broadcast %cst_35 : f32 to vector<5x1x128xf32>
    %152 = arith.subf %151, %150 : vector<5x1x128xf32>
    %153 = arith.mulf %144, %152 : vector<5x1x128xf32>
    %cst_36 = arith.constant 0.00833333377 : f32
    %154 = vector.broadcast %cst_36 : f32 to vector<5x1x128xf32>
    %155 = arith.subf %154, %153 : vector<5x1x128xf32>
    %156 = arith.mulf %144, %155 : vector<5x1x128xf32>
    %cst_37 = arith.constant 0.0833333358 : f32
    %157 = vector.broadcast %cst_37 : f32 to vector<5x1x128xf32>
    %158 = arith.subf %157, %156 : vector<5x1x128xf32>
    %159 = arith.mulf %144, %158 : vector<5x1x128xf32>
    %160 = arith.subf %148, %159 : vector<5x1x128xf32>
    %161 = arith.subf %160, %139 : vector<5x1x128xf32>
    %162 = vector.extract_strided_slice %127 {offsets = [0, 0, 0], sizes = [4, 1, 128], strides = [1, 1, 1]} : vector<5x1x128xf32> to vector<4x1x128xf32>
    %163 = vector.extract_strided_slice %162 {offsets = [0, 0, 0], sizes = [1, 1, 128], strides = [1, 1, 1]} : vector<4x1x128xf32> to vector<1x1x128xf32>
    %164 = vector.shape_cast %163 : vector<1x1x128xf32> to vector<1x128xf32>
    %165 = vector.extract_strided_slice %162 {offsets = [1, 0, 0], sizes = [1, 1, 128], strides = [1, 1, 1]} : vector<4x1x128xf32> to vector<1x1x128xf32>
    %166 = vector.shape_cast %165 : vector<1x1x128xf32> to vector<1x128xf32>
    %167 = arith.addf %164, %166 : vector<1x128xf32>
    %168 = vector.extract_strided_slice %162 {offsets = [2, 0, 0], sizes = [1, 1, 128], strides = [1, 1, 1]} : vector<4x1x128xf32> to vector<1x1x128xf32>
    %169 = vector.shape_cast %168 : vector<1x1x128xf32> to vector<1x128xf32>
    %170 = arith.addf %167, %169 : vector<1x128xf32>
    %171 = vector.extract_strided_slice %162 {offsets = [3, 0, 0], sizes = [1, 1, 128], strides = [1, 1, 1]} : vector<4x1x128xf32> to vector<1x1x128xf32>
    %172 = vector.shape_cast %171 : vector<1x1x128xf32> to vector<1x128xf32>
    %173 = arith.addf %170, %172 : vector<1x128xf32>
    %cst_38 = arith.constant 1.000000e+00 : f32
    %174 = vector.broadcast %cst_38 : f32 to vector<4x1x128xf32>
    %175 = arith.subf %60, %174 : vector<4x1x128xf32>
    %176 = vector.extract_strided_slice %161 {offsets = [0, 0, 0], sizes = [4, 1, 128], strides = [1, 1, 1]} : vector<5x1x128xf32> to vector<4x1x128xf32>
    %177 = arith.mulf %175, %176 : vector<4x1x128xf32>
    %178 = vector.extract_strided_slice %177 {offsets = [0, 0, 0], sizes = [1, 1, 128], strides = [1, 1, 1]} : vector<4x1x128xf32> to vector<1x1x128xf32>
    %179 = vector.shape_cast %178 : vector<1x1x128xf32> to vector<1x128xf32>
    %180 = vector.extract_strided_slice %177 {offsets = [1, 0, 0], sizes = [1, 1, 128], strides = [1, 1, 1]} : vector<4x1x128xf32> to vector<1x1x128xf32>
    %181 = vector.shape_cast %180 : vector<1x1x128xf32> to vector<1x128xf32>
    %182 = arith.addf %179, %181 : vector<1x128xf32>
    %183 = vector.extract_strided_slice %177 {offsets = [2, 0, 0], sizes = [1, 1, 128], strides = [1, 1, 1]} : vector<4x1x128xf32> to vector<1x1x128xf32>
    %184 = vector.shape_cast %183 : vector<1x1x128xf32> to vector<1x128xf32>
    %185 = arith.addf %182, %184 : vector<1x128xf32>
    %186 = vector.extract_strided_slice %177 {offsets = [3, 0, 0], sizes = [1, 1, 128], strides = [1, 1, 1]} : vector<4x1x128xf32> to vector<1x1x128xf32>
    %187 = vector.shape_cast %186 : vector<1x1x128xf32> to vector<1x128xf32>
    %188 = arith.addf %185, %187 : vector<1x128xf32>
    %cst_39 = arith.constant 4.000000e+00 : f32
    %189 = vector.broadcast %cst_39 : f32 to vector<1x128xf32>
    %190 = arith.subf %71, %189 : vector<1x128xf32>
    %191 = vector.extract_strided_slice %161 {offsets = [4, 0, 0], sizes = [1, 1, 128], strides = [1, 1, 1]} : vector<5x1x128xf32> to vector<1x1x128xf32>
    %192 = vector.shape_cast %191 : vector<1x1x128xf32> to vector<1x128xf32>
    %193 = arith.mulf %190, %192 : vector<1x128xf32>
    %194 = arith.subf %188, %193 : vector<1x128xf32>
    %195 = vector.extract_strided_slice %127 {offsets = [4, 0, 0], sizes = [1, 1, 128], strides = [1, 1, 1]} : vector<5x1x128xf32> to vector<1x1x128xf32>
    %196 = vector.shape_cast %195 : vector<1x1x128xf32> to vector<1x128xf32>
    %197 = arith.subf %196, %173 : vector<1x128xf32>
    %198 = arith.addf %194, %197 : vector<1x128xf32>
    %cst_40 = arith.constant -1.79175949 : f32
    %199 = vector.broadcast %cst_40 : f32 to vector<1x128xf32>
    %200 = arith.addf %198, %199 : vector<1x128xf32>
    %201 = arith.addf %36, %56 : vector<1x128xf32>
    %202 = vector.broadcast %0 : f32 to vector<1x128xf32>
    %203 = arith.mulf %202, %200 : vector<1x128xf32>
    %204 = arith.addf %201, %203 : vector<1x128xf32>
    %205 = tpu.iota {dimensions = array<i32: 0>} : vector<1x128xi32>
    %206 = tpu.iota {dimensions = array<i32: 1>} : vector<1x128xi32>
    %c1_i32_41 = arith.constant 1 : i32
    %207 = arith.muli %arg0, %c1_i32_41 : i32
    %208 = arith.addi %207, %3 : i32
    %209 = vector.broadcast %208 : i32 to vector<1x128xi32>
    %210 = arith.addi %209, %205 : vector<1x128xi32>
    %c128_i32 = arith.constant 128 : i32
    %211 = vector.broadcast %c128_i32 : i32 to vector<1x128xi32>
    %212 = arith.muli %210, %211 : vector<1x128xi32>
    %213 = arith.addi %212, %206 : vector<1x128xi32>
    %c8_i32 = arith.constant 8 : i32
    %214 = vector.broadcast %c8_i32 : i32 to vector<1x128xi32>
    %215 = arith.cmpi slt, %213, %214 : vector<1x128xi32>
    %cst_42 = arith.constant 0.000000e+00 : f32
    %216 = vector.broadcast %cst_42 : f32 to vector<1x128xf32>
    %217 = arith.select %215, %204, %216 : vector<1x128xi1>, vector<1x128xf32>
    %218 = arith.addf %1, %217 : vector<1x128xf32>
    %c1_i32_43 = arith.constant 1 : i32
    %219 = vector.shape_cast %218 : vector<1x128xf32> to vector<1x1x128xf32>
    %cst_44 = arith.constant dense<0.000000e+00> : vector<1xf32>
    %220 = vector.multi_reduction <add>, %219, %cst_44 [1, 2] : vector<1x1x128xf32> to vector<1xf32>
    %221 = vector.shape_cast %220 : vector<1xf32> to vector<1x1x1xf32>
    %222 = vector.extract %221[0, 0, 0] : f32 from vector<1x1x1xf32>
    %223 = vector.broadcast %222 : f32 to vector<1x1x128xf32>
    %c0_45 = arith.constant 0 : index
    %c0_46 = arith.constant 0 : index
    %c0_47 = arith.constant 0 : index
    %224 = vector.load %arg4[%c0_45, %c0_46, %c0_47] : memref<1x1x128xf32, #tpu.memory_space<vmem>>, vector<1x1x128xf32>
    tpu.vector_store %arg4[%c0_45, %c0_46, %c0_47], %223 {strides = array<i32>} : memref<1x1x128xf32, #tpu.memory_space<vmem>>, vector<1x1x128xf32>,
    return
  }
  func.func @transform_0(%arg0: i32) -> i32 {
    %c0_i32 = arith.constant 0 : i32
    %c0_i32_0 = arith.constant 0 : i32
    return %c0_i32 : i32
  }
  func.func @transform_1(%arg0: i32) -> (i32, i32, i32) {
    %c0_i32 = arith.constant 0 : i32
    %c0_i32_0 = arith.constant 0 : i32
    %c0_i32_1 = arith.constant 0 : i32
    return %c0_i32, %arg0, %c0_i32_0 : i32, i32, i32
  }
  func.func @transform_2(%arg0: i32) -> (i32, i32, i32) {
    %c0_i32 = arith.constant 0 : i32
    %c0_i32_0 = arith.constant 0 : i32
    %c0_i32_1 = arith.constant 0 : i32
    return %c0_i32, %arg0, %c0_i32_0 : i32, i32, i32
  }
  func.func @transform_3(%arg0: i32) -> (i32, i32, i32) {
    %c0_i32 = arith.constant 0 : i32
    %c0_i32_0 = arith.constant 0 : i32
    %c0_i32_1 = arith.constant 0 : i32
    return %arg0, %c0_i32, %c0_i32_0 : i32, i32, i32
  }
}

</mosaic_0001>

<bundles_post_ra>
// kernel: tpu_custom_call.1
= control target key start
LH: loop header
LB: loop body
LE: loop exit
PB: predicated region body
PF: predicated region fallthrough
CT: control target
= control target key end

     0   :  { %9 = vsyncpa [#allocation4], 0  ;;  %s947_s0 = inlined_call_operand.<no memory space> [shape: f32[1], index: 0, kind: input, shape index: {}]   ;;  %s948_s1 = inlined_call_operand.hbm [shape: f32[4,1,128], index: 1, kind: input, shape index: {}]   ;;  %s949_s2 = inlined_call_operand.hbm [shape: f32[4,1,128], index: 2, kind: input, shape index: {}]   ;;  %s950_s3 = inlined_call_operand.hbm [shape: f32[1,1,128], index: 3, kind: output, shape index: {}]  }
   0x1   :  { %10 = vsyncpa [#allocation7], 0 }
   0x2   :  { %11 = vsyncpa [#allocation5], 0  ;;  %s608_s12 = smov [#allocation3]  }
   0x3   :  { %s19_s13 = sshll.u32 %s608_s12, 4  ;;  %s20_s13 = int_to_ptr.vmem [resolvable:$true] %s19_s13 }
   0x4   :  { %s550_s14 = scalar_lea.vmem %s20_s13, 64  ;;  %p555_p1 = scmp.lt.s32.totalorder %s20_s13, %s20_s13 }
   0x5   :  { %p551_p0 = scmp.ne.s32.totalorder %s20_s13, %s550_s14  ;;  %p556_p2 = scmp.lt.s32.totalorder %s550_s14, %s550_s14 }
   0x7   :  { %p557_p3 = por %p556_p2, %p555_p1 }
   0x9   :  { %p558_p4 = pnand %p557_p3, %p551_p0 }
   0xb   :  { %561 = shalt.err (!%p558_p4)
}
   0xc   :  { %s609_s15 = smov 16   ;;  %s610_s16 = smov 1  }
   0xd   :  { %25 = dma.hbm_to_vmem [thread:$0]  %s948_s1, 64, %s20_s13, [#allocation4], %s609_s15, %s609_s15, %s610_s16  }
   0xe   :  { %s611_s19 = smov [#allocation6]  }
   0xf   :  { %s31_s20 = sshll.u32 %s611_s19, 4  ;;  %s32_s20 = int_to_ptr.vmem [resolvable:$true] %s31_s20 }
  0x10   :  { %s570_s21 = scalar_lea.vmem %s32_s20, 64  ;;  %p575_p6 = scmp.lt.s32.totalorder %s32_s20, %s32_s20 }
  0x11   :  { %p571_p5 = scmp.ne.s32.totalorder %s32_s20, %s570_s21  ;;  %p576_p7 = scmp.lt.s32.totalorder %s570_s21, %s570_s21 }
  0x13   :  { %p577_p8 = por %p576_p7, %p575_p6 }
  0x15   :  { %p578_p9 = pnand %p577_p8, %p571_p5 }
  0x17   :  { %581 = shalt.err (!%p578_p9)
}
  0x18   :  { %37 = dma.hbm_to_vmem [thread:$0]  %s949_s2, 64, %s32_s20, [#allocation7], %s609_s15, %s609_s15, %s610_s16  }
  0x19   :  { %602 = dma.done.wait [#allocation4], 64  }
  0x1a   :  { %603 = vsyncadd [#allocation4], 4294967232 }
  0x1b   :  { %604 = dma.done.wait [#allocation7], 64  }
  0x1c   :  { %605 = vsyncadd [#allocation7], 4294967232  ;;  %v45_v0 = vld [vmem:[#allocation3] sm:$0x1]  ;;  %v46_v1 = vld [vmem:[#allocation3 + $0x1] sm:$0x1] }
  0x1d   :  { %v47_v2 = vld [vmem:[#allocation3 + $0x2] sm:$0x1]  ;;  %v48_v3 = vld [vmem:[#allocation3 + $0x3] sm:$0x1]  ;;  %v639_v4 = vld [vmem:[#allocation6] sm:$0x1] }
  0x1e   :  { %v641_v5 = vld [vmem:[#allocation6 + $0x1] sm:$0x1]  ;;  %v643_v6 = vld [vmem:[#allocation6 + $0x2] sm:$0x1]  ;;  %v89_v8 = vsub.f32 1.0, %v45_v0  ;;  %v90_v9 = vsub.f32 1.0, %v46_v1 }
  0x1f   :  { %v53_v7 = vadd.f32 %v641_v5, %v639_v4  ;;  %v91_v10 = vsub.f32 1.0, %v47_v2  ;;  %v92_v11 = vsub.f32 1.0, %v48_v3  ;;  %v647_v12 = vld [vmem:[#allocation6 + $0x3] sm:$0x1]  ;;  %vm436_vm1 = vcmask 1040384  }
  0x20   :  { %v93_v14 = vmul.f32 %v89_v8, %v639_v4  ;;  %v94_v15 = vmul.f32 %v90_v9, %v641_v5 }
  0x21   :  { %v54_v13 = vadd.f32 %v53_v7, %v643_v6  ;;  %v95_v16 = vmul.f32 %v91_v10, %v643_v6  ;;  %v96_v20 = vmul.f32 %v92_v11, %v647_v12 }
  0x22   :  { %v656_v18 = vadd.f32 %v93_v14, %v45_v0  ;;  %v658_v19 = vadd.f32 %v94_v15, %v46_v1 }
  0x23   :  { %v654_v17 = vadd.f32 %v54_v13, %v647_v12  ;;  %v661_v21 = vadd.f32 %v95_v16, %v47_v2  ;;  %v666_v23 = vadd.f32 %v96_v20, %v48_v3 }
  0x24   :  { %v101_v22 = vadd.f32 %v658_v19, %v656_v18  ;;  %v673_v26 = vadd.f32 -1.0, %v656_v18  ;;  %v676_v27 = vadd.f32 -1.0, %v658_v19 }
  0x25   :  { %478 = vrcp.f32 %v654_v17  ;;  %v679_v28 = vadd.f32 -1.0, %v661_v21  ;;  %v683_v30 = vadd.f32 -1.0, %v666_v23  ;;  %v73_v42 = vsub.f32 %v654_v17, %v639_v4 }
  0x26   :  { %v102_v24 = vadd.f32 %v101_v22, %v661_v21  ;;  %v119_v29 = vadd.f32 33.458332, %v673_v26  ;;  %v120_v32 = vadd.f32 33.458332, %v676_v27  ;;  %v174_v51 = vadd.f32 21.0, %v673_v26 }
  0x27   :  { %v121_v33 = vadd.f32 33.458332, %v679_v28  ;;  %v122_v35 = vadd.f32 33.458332, %v683_v30  ;;  %v175_v52 = vadd.f32 21.0, %v676_v27  ;;  %v74_v57 = vsub.f32 %v654_v17, %v641_v5 }
  0x28   :  { %v670_v25 = vadd.f32 %v102_v24, %v666_v23  ;;  %v124_v37 = vmul.f32 %v673_v26, %v119_v29  ;;  %v125_v43 = vmul.f32 %v676_v27, %v120_v32  ;;  %v176_v60 = vadd.f32 21.0, %v679_v28 }
  0x29   :  { %v126_v44 = vmul.f32 %v679_v28, %v121_v33  ;;  %v127_v49 = vmul.f32 %v683_v30, %v122_v35  ;;  %v177_v63 = vadd.f32 21.0, %v683_v30  ;;  %v179_v10 = vmul.f32 %v673_v26, %v174_v51 }
  0x2a   :  { %v686_v31 = vadd.f32 -1.0, %v670_v25  ;;  %v129_v50 = vadd.f32 466.3342, %v124_v37  ;;  %v130_v58 = vadd.f32 466.3342, %v125_v43  ;;  %v180_v11 = vmul.f32 %v676_v27, %v175_v52 }
  0x2b   :  { %v131_v59 = vadd.f32 466.3342, %v126_v44  ;;  %v109_v13 = vadd.f32 5.0, %v673_v26  ;;  %v110_v14 = vadd.f32 5.0, %v676_v27  ;;  %v181_v16 = vmul.f32 %v679_v28, %v176_v60 }
  0x2c   :  { %v123_v36 = vadd.f32 33.458332, %v686_v31  ;;  %v134_v7 = vmul.f32 %v673_v26, %v129_v50  ;;  %v135_v15 = vmul.f32 %v676_v27, %v130_v58  ;;  %v182_v24 = vmul.f32 %v683_v30, %v177_v63 }
  0x2d   :  { %v136_v22 = vmul.f32 %v679_v28, %v131_v59  ;;  %v734_v32 = vmul.f32 %v73_v42, %v639_v4  ;;  %v111_v33 = vadd.f32 5.0, %v679_v28  ;;  %v112_v35 = vadd.f32 5.0, %v683_v30 }
  0x2e   :  { %v128_v56 = vmul.f32 %v686_v31, %v123_v36  ;;  %v743_v43 = vadd.f32 0.5, %v109_v13  ;;  %v140_v44 = vadd.f32 3465.7095, %v135_v15  ;;  %v113_v59 = vadd.f32 5.0, %v686_v31 }
  0x2f   :  { %v141_v42 = vadd.f32 3465.7095, %v136_v22 }
  0x30   :  { %v133_v9 = vadd.f32 466.3342, %v128_v56  ;;  %v767_v22 = vadd.f32 0.5, %v113_v59  ;;  %480 = vlog2.f32 %v743_v43 }
  0x31   :  { %v146_v60 = vmul.f32 %v679_v28, %v141_v42 }
  0x32   :  { %v690_v34 = vpop.eup %478  ;;  %v138_v37 = vmul.f32 %v686_v31, %v133_v9 }
  0x33   :  { %v58_v38 = vmul.f32 %v690_v34, %v639_v4  ;;  %v59_v39 = vmul.f32 %v690_v34, %v641_v5  ;;  %v60_v40 = vmul.f32 %v690_v34, %v643_v6  ;;  %v61_v41 = vmul.f32 %v690_v34, %v647_v12 }
  0x34   :  { %v745_v4 = vadd.f32 0.5, %v110_v14  ;;  %v143_v52 = vadd.f32 3465.7095, %v138_v37 }
  0x35   :  { %v62_v45 = vsub.f32 %v45_v0, %v58_v38  ;;  %v63_v46 = vsub.f32 %v46_v1, %v59_v39  ;;  %v64_v47 = vsub.f32 %v47_v2, %v60_v40  ;;  %v65_v48 = vsub.f32 %v48_v3, %v61_v41 }
  0x36   :  { %v178_v0 = vadd.f32 21.0, %v686_v31  ;;  %v75_v1 = vsub.f32 %v654_v17, %v643_v6  ;;  %v719_v2 = vadd.f32 1.0, %v654_v17  ;;  %v132_v3 = vadd.f32 466.3342, %v127_v49 }
  0x37   :  { %v66_v53 = vmul.f32 %v62_v45, %v62_v45  ;;  %v67_v54 = vmul.f32 %v63_v46, %v63_v46  ;;  %v68_v55 = vmul.f32 %v64_v47, %v64_v47  ;;  %v69_v61 = vmul.f32 %v65_v48, %v65_v48 }
  0x38   :  { %v183_v29 = vmul.f32 %v686_v31, %v178_v0  ;;  %v137_v36 = vmul.f32 %v683_v30, %v132_v3  ;;  %v139_v38 = vadd.f32 3465.7095, %v134_v7  ;;  %v184_v39 = vadd.f32 175.0, %v179_v10 }
  0x39   :  { %v70_v62 = vadd.f32 %v67_v54, %v66_v53  ;;  %v185_v40 = vadd.f32 175.0, %v180_v11  ;;  %v741_v41 = vmul.f32 %v74_v57, %v641_v5  ;;  %v186_v45 = vadd.f32 175.0, %v181_v16 }
  0x3a   :  { %v187_v46 = vadd.f32 175.0, %v182_v24  ;;  %v188_v47 = vadd.f32 175.0, %v183_v29  ;;  %v747_v48 = vadd.f32 0.5, %v111_v33  ;;  %v749_v49 = vadd.f32 0.5, %v112_v35 }
  0x3b   :  { %v71_v8 = vadd.f32 %v70_v62, %v68_v55  ;;  %v142_v50 = vadd.f32 3465.7095, %v137_v36  ;;  %v189_v51 = vmul.f32 %v673_v26, %v184_v39  ;;  %v144_v5 = vmul.f32 %v673_v26, %v139_v38 }
  0x3c   :  { %v190_v53 = vmul.f32 %v676_v27, %v185_v40  ;;  %v191_v54 = vmul.f32 %v679_v28, %v186_v45  ;;  %v145_v55 = vmul.f32 %v676_v27, %v140_v44  ;;  %v192_v56 = vmul.f32 %v683_v30, %v187_v46 }
  0x3d   :  { %v728_v20 = vadd.f32 %v71_v8, %v69_v61  ;;  %v193_v57 = vmul.f32 %v686_v31, %v188_v47  ;;  %v194_v58 = vadd.f32 735.0, %v189_v51  ;;  %v147_v63 = vmul.f32 %v683_v30, %v142_v50 }
  0x3e   :  { %v195_v61 = vadd.f32 735.0, %v190_v53  ;;  %v196_v62 = vadd.f32 735.0, %v191_v54  ;;  %v197_v0 = vadd.f32 735.0, %v192_v56  ;;  %v148_v8 = vmul.f32 %v686_v31, %v143_v52 }
  0x3f   :  { %v198_v3 = vadd.f32 735.0, %v193_v57  ;;  %v199_v7 = vmul.f32 %v673_v26, %v194_v58  ;;  %v149_v9 = vadd.f32 14484.914, %v144_v5  ;;  %v150_v13 = vadd.f32 14484.914, %v145_v55 }
  0x40   :  { %v200_v10 = vmul.f32 %v676_v27, %v195_v61  ;;  %v201_v11 = vmul.f32 %v679_v28, %v196_v62  ;;  %v202_v14 = vmul.f32 %v683_v30, %v197_v0  ;;  %v151_v24 = vadd.f32 14484.914, %v146_v60 }
  0x41   :  { %v203_v15 = vmul.f32 %v686_v31, %v198_v3  ;;  %v204_v16 = vadd.f32 1624.0, %v199_v7  ;;  %v152_v35 = vadd.f32 14484.914, %v147_v63  ;;  %v153_v39 = vadd.f32 14484.914, %v148_v8 }
  0x42   :  { %v205_v29 = vadd.f32 1624.0, %v200_v10  ;;  %v206_v33 = vadd.f32 1624.0, %v201_v11  ;;  %v207_v36 = vadd.f32 1624.0, %v202_v14  ;;  %v154_v40 = vmul.f32 %v673_v26, %v149_v9 }
  0x43   :  { %v208_v37 = vadd.f32 1624.0, %v203_v15  ;;  %v209_v38 = vmul.f32 %v673_v26, %v204_v16  ;;  %v155_v42 = vmul.f32 %v676_v27, %v150_v13  ;;  %v156_v51 = vmul.f32 %v679_v28, %v151_v24 }
  0x44   :  { %v210_v44 = vmul.f32 %v676_v27, %v205_v29  ;;  %v211_v45 = vmul.f32 %v679_v28, %v206_v33  ;;  %v212_v46 = vmul.f32 %v683_v30, %v207_v36  ;;  %482 = vlog2.f32 %v745_v4 }
  0x45   :  { %v213_v47 = vmul.f32 %v686_v31, %v208_v37  ;;  %v214_v50 = vadd.f32 1764.0, %v209_v38  ;;  %v157_v56 = vmul.f32 %v683_v30, %v152_v35  ;;  %484 = vlog2.f32 %v747_v48 }
  0x46   :  { %v215_v52 = vadd.f32 1764.0, %v210_v44  ;;  %v216_v5 = vadd.f32 1764.0, %v211_v45  ;;  %v217_v53 = vadd.f32 1764.0, %v212_v46  ;;  %486 = vlog2.f32 %v749_v49 }
  0x47   :  { %v218_v54 = vadd.f32 1764.0, %v213_v47  ;;  %v219_v55 = vmul.f32 %v673_v26, %v214_v50  ;;  %v158_v62 = vmul.f32 %v686_v31, %v153_v39  ;;  %488 = vlog2.f32 %v767_v22 }
  0x48   :  { %v220_v57 = vmul.f32 %v676_v27, %v215_v52  ;;  %v221_v58 = vmul.f32 %v679_v28, %v216_v5  ;;  %v222_v59 = vmul.f32 %v683_v30, %v217_v53  ;;  %v159_v3 = vadd.f32 32281.064, %v154_v40 }
  0x49   :  { %v223_v60 = vmul.f32 %v686_v31, %v218_v54  ;;  %v224_v61 = vadd.f32 720.0, %v219_v55  ;;  %v160_v7 = vadd.f32 32281.064, %v155_v42  ;;  %v161_v9 = vadd.f32 32281.064, %v156_v51 }
  0x4a   :  { %v225_v63 = vadd.f32 720.0, %v220_v57  ;;  %v226_v0 = vadd.f32 720.0, %v221_v58  ;;  %v227_v8 = vadd.f32 720.0, %v222_v59  ;;  %v294_v10 = vadd.f32 1.0, %v656_v18 }
  0x4b   :  { %490 = vrcp.f32 %v224_v61  ;;  %v295_v11 = vadd.f32 1.0, %v658_v19  ;;  %v162_v13 = vadd.f32 32281.064, %v157_v56  ;;  %v228_v14 = vadd.f32 720.0, %v223_v60 }
  0x4c   :  { %492 = vrcp.f32 %v225_v63  ;;  %v296_v15 = vadd.f32 1.0, %v661_v21  ;;  %v76_v16 = vsub.f32 %v654_v17, %v647_v12  ;;  %v299_v24 = vmul.f32 %v294_v10, %v656_v18 }
  0x4d   :  { %494 = vrcp.f32 %v226_v0  ;;  %v79_v29 = vmul.f32 %v75_v1, %v643_v6  ;;  %v81_v33 = vadd.f32 %v741_v41, %v734_v32  ;;  %v163_v35 = vadd.f32 32281.064, %v158_v62  ;;  %v481_v32 = vpop.eup %480 }
  0x4e   :  { %496 = vrcp.f32 %v227_v8  ;;  %v300_v36 = vmul.f32 %v295_v11, %v658_v19  ;;  %v164_v37 = vmul.f32 %v673_v26, %v159_v3  ;;  %v165_v38 = vmul.f32 %v676_v27, %v160_v7 }
  0x4f   :  { %498 = vrcp.f32 %v719_v2  ;;  %v301_v39 = vmul.f32 %v296_v15, %v661_v21  ;;  %v166_v40 = vmul.f32 %v679_v28, %v161_v9  ;;  %v167_v44 = vmul.f32 %v683_v30, %v162_v13 }
  0x50   :  { %500 = vrcp.f32 %v228_v14  ;;  %v319_v6 = vadd.f32 2.0, %v656_v18  ;;  %v810_v17 = vmul.f32 %v76_v16, %v647_v12  ;;  %v813_v1 = vadd.f32 2.0, %v658_v19 }
  0x51   :  { %502 = vrcp.f32 %v299_v24  ;;  %v424_v2 = vlaneseq  ;;  %v815_v41 = vadd.f32 %v81_v33, %v79_v29  ;;  %v168_v45 = vmul.f32 %v686_v31, %v163_v35  ;;  %v483_v46 = vpop.eup %482 }
  0x52   :  { %504 = vrcp.f32 %v300_v36  ;;  %v819_v42 = vadd.f32 2.0, %v661_v21  ;;  %v169_v47 = vadd.f32 29969.594, %v164_v37  ;;  %v170_v50 = vadd.f32 29969.594, %v165_v38  ;;  %v485_v51 = vpop.eup %484 }
  0x53   :  { %506 = vrcp.f32 %v301_v39  ;;  %v822_v12 = vadd.f32 2.0, %v666_v23  ;;  %v171_v52 = vadd.f32 29969.594, %v166_v40  ;;  %v172_v5 = vadd.f32 29969.594, %v167_v44  ;;  %v487_v54 = vpop.eup %486 }
  0x54   :  { %v825_v53 = vadd.f32 2.0, %v670_v25  ;;  %508 = vrcp.f32 %v319_v6  ;;  %v239_v55 = vadd.f32 0.5, %v673_v26  ;;  %v240_v56 = vadd.f32 0.5, %v676_v27  ;;  %v489_v58 = vpop.eup %488 }
  0x55   :  { %v245_v57 = vmul.f32 0.6931472, %v481_v32  ;;  %510 = vrcp.f32 %v813_v1  ;;  %v241_v59 = vadd.f32 0.5, %v679_v28  ;;  %v247_v60 = vmul.f32 0.6931472, %v483_v46 }
  0x56   :  { %v297_v61 = vadd.f32 1.0, %v666_v23  ;;  %512 = vrcp.f32 %v819_v42  ;;  %v242_v63 = vadd.f32 0.5, %v683_v30  ;;  %v243_v0 = vadd.f32 0.5, %v686_v31 }
  0x57   :  { %v249_v3 = vmul.f32 0.6931472, %v485_v51  ;;  %514 = vrcp.f32 %v822_v12  ;;  %v251_v9 = vmul.f32 0.6931472, %v487_v54  ;;  %v284_v10 = vmul.f32 2.0, %v656_v18 }
  0x58   :  { %v491_v62 = vpop.eup %490  ;;  %516 = vrcp.f32 %v825_v53  ;;  %v254_v14 = vmul.f32 %v245_v57, %v239_v55  ;;  %v298_v15 = vadd.f32 1.0, %v670_v25  ;;  %v255_v29 = vmul.f32 %v247_v60, %v240_v56 }
  0x59   :  { %v493_v7 = vpop.eup %492  ;;  %v230_v8 = vmul.f32 %v491_v62, %v169_v47  ;;  %518 = vlog2.f32 %v319_v6  ;;  %v302_v31 = vmul.f32 %v297_v61, %v666_v23  ;;  %v253_v35 = vmul.f32 0.6931472, %v489_v58 }
  0x5a   :  { %v495_v11 = vpop.eup %494  ;;  %v232_v13 = vmul.f32 %v493_v7, %v170_v50  ;;  %v256_v36 = vmul.f32 %v249_v3, %v241_v59  ;;  %v257_v18 = vmul.f32 %v251_v9, %v242_v63  ;;  %v285_v38 = vmul.f32 2.0, %v658_v19 }
  0x5b   :  { %v497_v16 = vpop.eup %496  ;;  %v234_v24 = vmul.f32 %v495_v11, %v171_v52  ;;  %520 = vlog2.f32 %v230_v8  ;;  %v286_v39 = vmul.f32 2.0, %v661_v21  ;;  %v173_v44 = vadd.f32 29969.594, %v168_v45 }
  0x5c   :  { %v236_v33 = vmul.f32 %v497_v16, %v172_v5  ;;  %522 = vlog2.f32 %v232_v13  ;;  %v840_v37 = vpop.eup %498  ;;  %v844_v6 = vadd.f32 0.9189385, %v254_v14  ;;  %v287_v32 = vmul.f32 2.0, %v666_v23 }
  0x5d   :  { %524 = vlog2.f32 %v234_v24  ;;  %v501_v40 = vpop.eup %500  ;;  %v847_v47 = vadd.f32 0.9189385, %v255_v29  ;;  %v288_v50 = vmul.f32 2.0, %v670_v25  ;;  %v289_v51 = vadd.f32 1.0, %v284_v10 }
  0x5e   :  { %526 = vlog2.f32 %v236_v33  ;;  %v503_v46 = vpop.eup %502  ;;  %v258_v5 = vmul.f32 %v253_v35, %v243_v0  ;;  %v850_v54 = vadd.f32 0.9189385, %v256_v36  ;;  %v303_v19 = vmul.f32 %v298_v15, %v670_v25 }
  0x5f   :  { %528 = vrcp.f32 %v302_v31  ;;  %v505_v52 = vpop.eup %504  ;;  %v854_v45 = vadd.f32 0.9189385, %v257_v18  ;;  %v290_v55 = vadd.f32 1.0, %v285_v38  ;;  %v291_v23 = vadd.f32 1.0, %v286_v39 }
  0x60   :  { %530 = vlog2.f32 %v813_v1  ;;  %v507_v21 = vpop.eup %506  ;;  %v238_v57 = vmul.f32 %v501_v40, %v173_v44  ;;  %v264_v58 = vsub.f32 %v844_v6, %v743_v43  ;;  %v859_v59 = vadd.f32 1.0, %v287_v32 }
  0x61   :  { %532 = vlog2.f32 %v819_v42  ;;  %v509_v56 = vpop.eup %508  ;;  %v265_v1 = vsub.f32 %v847_v47, %v745_v4  ;;  %v864_v61 = vadd.f32 1.0, %v288_v50  ;;  %v869_v63 = vadd.f32 0.9189385, %v258_v5 }
  0x62   :  { %534 = vlog2.f32 %v822_v12  ;;  %v511_v60 = vpop.eup %510  ;;  %v866_v62 = vmul.f32 %v509_v56, %v509_v56  ;;  %v266_v43 = vsub.f32 %v850_v54, %v747_v48  ;;  %v267_v3 = vsub.f32 %v854_v45, %v749_v49 }
  0x63   :  { %536 = vlog2.f32 %v825_v53  ;;  %v513_v42 = vpop.eup %512  ;;  %v873_v0 = vmul.f32 %v511_v60, %v511_v60  ;;  %v877_v4 = vmul.f32 %v503_v46, %v289_v51  ;;  %v882_v9 = vmul.f32 %v505_v52, %v290_v55 }
  0x64   :  { %538 = vrcp.f32 %v303_v19  ;;  %v515_v12 = vpop.eup %514  ;;  %v879_v7 = vmul.f32 %v513_v42, %v513_v42  ;;  %v359_v8 = vmul.f32 0.004166667, %v866_v62  ;;  %v887_v13 = vmul.f32 %v507_v21, %v291_v23 }
  0x65   :  { %v517_v53 = vpop.eup %516  ;;  %540 = vlog2.f32 %v238_v57  ;;  %v884_v10 = vmul.f32 %v515_v12, %v515_v12  ;;  %v360_v48 = vmul.f32 0.004166667, %v873_v0  ;;  %v892_v29 = vmul.f32 0.5, %v509_v56 }
  0x66   :  { %v519_v11 = vpop.eup %518  ;;  %v889_v14 = vmul.f32 %v517_v53, %v517_v53  ;;  %v361_v15 = vmul.f32 0.004166667, %v879_v7  ;;  %v364_v16 = vsub.f32 0.003968254, %v359_v8  ;;  %v894_v31 = vmul.f32 0.5, %v511_v60 }
  0x67   :  { %v362_v33 = vmul.f32 0.004166667, %v884_v10  ;;  %v365_v35 = vsub.f32 0.003968254, %v360_v48  ;;  %v897_v18 = vmul.f32 0.6931472, %v519_v11 }
  0x68   :  { %v521_v24 = vpop.eup %520  ;;  %v363_v38 = vmul.f32 0.004166667, %v889_v14  ;;  %v366_v39 = vsub.f32 0.003968254, %v361_v15  ;;  %v369_v40 = vmul.f32 %v364_v16, %v866_v62  ;;  %v351_v32 = vmul.f32 0.5, %v513_v42 }
  0x69   :  { %v523_v36 = vpop.eup %522  ;;  %v270_v6 = vmul.f32 0.6931472, %v521_v24  ;;  %v367_v46 = vsub.f32 0.003968254, %v362_v33  ;;  %v370_v47 = vmul.f32 %v365_v35, %v873_v0  ;;  %v352_v52 = vmul.f32 0.5, %v515_v12 }
  0x6a   :  { %v525_v44 = vpop.eup %524  ;;  %v272_v51 = vmul.f32 0.6931472, %v523_v36  ;;  %v368_v5 = vsub.f32 0.003968254, %v363_v38  ;;  %v371_v54 = vmul.f32 %v366_v39, %v879_v7  ;;  %v353_v55 = vmul.f32 0.5, %v517_v53 }
  0x6b   :  { %v527_v50 = vpop.eup %526  ;;  %v274_v21 = vmul.f32 0.6931472, %v525_v44  ;;  %v372_v23 = vmul.f32 %v367_v46, %v884_v10  ;;  %v374_v56 = vsub.f32 0.008333334, %v369_v40  ;;  %v354_v42 = vsub.f32 %v897_v18, %v892_v29 }
  0x6c   :  { %v529_v19 = vpop.eup %528  ;;  %v276_v60 = vmul.f32 0.6931472, %v527_v50  ;;  %v373_v8 = vmul.f32 %v368_v5, %v889_v14  ;;  %v375_v48 = vsub.f32 0.008333334, %v370_v47  ;;  %v279_v15 = vadd.f32 %v270_v6, %v264_v58 }
  0x6d   :  { %v531_v57 = vpop.eup %530  ;;  %v376_v16 = vsub.f32 0.008333334, %v371_v54  ;;  %v377_v24 = vsub.f32 0.008333334, %v372_v23  ;;  %v280_v35 = vadd.f32 %v272_v51, %v265_v1  ;;  %v379_v38 = vmul.f32 %v374_v56, %v866_v62 }
  0x6e   :  { %v533_v11 = vpop.eup %532  ;;  %v342_v12 = vmul.f32 0.6931472, %v531_v57  ;;  %v378_v53 = vsub.f32 0.008333334, %v373_v8  ;;  %v281_v40 = vadd.f32 %v274_v21, %v266_v43  ;;  %v380_v46 = vmul.f32 %v375_v48, %v873_v0 }
  0x6f   :  { %v535_v33 = vpop.eup %534  ;;  %v344_v36 = vmul.f32 0.6931472, %v533_v11  ;;  %v381_v29 = vmul.f32 %v376_v16, %v879_v7  ;;  %v382_v6 = vmul.f32 %v377_v24, %v884_v10  ;;  %v384_v51 = vsub.f32 0.083333336, %v379_v38 }
  0x70   :  { %v537_v39 = vpop.eup %536  ;;  %v346_v44 = vmul.f32 0.6931472, %v535_v33  ;;  %v355_v58 = vsub.f32 %v342_v12, %v894_v31  ;;  %v383_v50 = vmul.f32 %v378_v53, %v889_v14  ;;  %v385_v5 = vsub.f32 0.083333336, %v380_v46 }
  0x71   :  { %v539_v18 = vpop.eup %538  ;;  %v348_v47 = vmul.f32 0.6931472, %v537_v39  ;;  %v356_v1 = vsub.f32 %v344_v36, %v351_v32  ;;  %v386_v54 = vsub.f32 0.083333336, %v381_v29  ;;  %v387_v21 = vsub.f32 0.083333336, %v382_v6 }
  0x72   :  { %v541_v23 = vpop.eup %540  ;;  %v357_v56 = vsub.f32 %v346_v44, %v352_v52  ;;  %v388_v57 = vsub.f32 0.083333336, %v383_v50  ;;  %v389_v8 = vmul.f32 %v384_v51, %v866_v62  ;;  %v390_v48 = vmul.f32 %v385_v5, %v873_v0 }
  0x73   :  { %v358_v43 = vsub.f32 %v348_v47, %v353_v55  ;;  %v391_v11 = vmul.f32 %v386_v54, %v879_v7  ;;  %v404_v31 = vadd.f32 %v280_v35, %v279_v15  ;;  %v268_v12 = vsub.f32 %v869_v63, %v767_v22 }
  0x74   :  { %v316_v32 = vmul.f32 %v529_v19, %v859_v59  ;;  %v392_v16 = vmul.f32 %v387_v21, %v884_v10  ;;  %v393_v24 = vmul.f32 %v388_v57, %v889_v14  ;;  %v318_v52 = vmul.f32 %v539_v18, %v864_v61 }
  0x75   :  { %v394_v55 = vsub.f32 %v354_v42, %v389_v8  ;;  %v395_v33 = vsub.f32 %v355_v58, %v390_v48  ;;  %v396_v36 = vsub.f32 %v356_v1, %v391_v11  ;;  %v278_v62 = vmul.f32 0.6931472, %v541_v23 }
  0x76   :  { %v282_v0 = vadd.f32 %v276_v60, %v267_v3  ;;  %v397_v7 = vsub.f32 %v357_v56, %v392_v16  ;;  %v398_v15 = vsub.f32 %v358_v43, %v393_v24  ;;  %v405_v10 = vadd.f32 %v404_v31, %v281_v40 }
  0x77   :  { %v399_v22 = vsub.f32 %v394_v55, %v877_v4  ;;  %v400_v59 = vsub.f32 %v395_v33, %v882_v9  ;;  %v401_v63 = vsub.f32 %v396_v36, %v887_v13  ;;  %v83_v61 = vadd.f32 %v815_v41, %v810_v17 }
  0x78   :  { %v84_v14 = vmul.f32 %v690_v34, %v690_v34  ;;  %v402_v19 = vsub.f32 %v397_v7, %v316_v32  ;;  %v470_v42 = vadd.f32 -4.0, %v670_v25  ;;  %v403_v49 = vsub.f32 %v398_v15, %v318_v52 }
  0x79   :  { %v407_v45 = vmul.f32 %v673_v26, %v399_v22  ;;  %v408_v3 = vmul.f32 %v676_v27, %v400_v59  ;;  %v409_v4 = vmul.f32 %v679_v28, %v401_v63  ;;  %v283_v9 = vadd.f32 %v278_v62, %v268_v12 }
  0x7a   :  { %v406_v60 = vadd.f32 %v405_v10, %v282_v0  ;;  %v410_v13 = vmul.f32 %v683_v30, %v402_v19  ;;  %v425_v17 = vshrl.u32 %v424_v2, 7  ;;  %v85_v41 = vmul.f32 %v84_v14, %v83_v61 }
  0x7b   :  { %v411_v35 = vadd.f32 %v408_v3, %v407_v45  ;;  %v415_v34 = vmul.f32 %v470_v42, %v403_v49  ;;  %v427_v25 = vand.u32 127, %v424_v2  ;;  %v421_v28 = vstv %s947_s0  ;;  %s612_s0 = smov [#allocation8]  }
  0x7c   :  { %v417_v39 = vsub.f32 %v283_v9, %v406_v60  ;;  %v431_v40 = vmul.u32 128, %v425_v17  ;;  %v88_v26 = vmul.f32 %v840_v37, %v85_v41  ;;  %s455_s24 = sshll.u32 %s612_s0, 4  ;;  %s456_s24 = int_to_ptr.vmem [resolvable:$true] %s455_s24 }
  0x7d   :  { %v412_v53 = vadd.f32 %v411_v35, %v409_v4  ;;  %s582_s26 = scalar_lea.vmem %s456_s24, 16  ;;  %s586_s27 = scalar_lea.vmem %s456_s24, 32 }
  0x7e   :  { %v432_v30 = vadd.s32 %v431_v40, %v427_v25  ;;  %v420_v29 = vadd.f32 %v88_v26, %v728_v20  ;;  %p583_p10 = scmp.ne.s32.totalorder %s456_s24, %s582_s26  ;;  %p587_p11 = scmp.lt.s32.totalorder %s456_s24, %s456_s24 }
  0x7f   :  { %v413_v38 = vadd.f32 %v412_v53, %v410_v13  ;;  %p588_p12 = scmp.lt.s32.totalorder %s586_s27, %s582_s26 }
  0x80   :  { %vm433_vm0 = vcmp.lt.s32.totalorder %v432_v30, 8 }
  0x81   :  { %v416_v27 = vsub.f32 %v413_v38, %v415_v34  ;;  %p589_p13 = por %p588_p12, %p587_p11 }
  0x83   :  { %v418_v44 = vadd.f32 %v417_v39, %v416_v27  ;;  %p590_p0 = pnand %p589_p13, %p583_p10 }
  0x85   :  { %v419_v46 = vadd.f32 -1.7917595, %v418_v44 }
  0x87   :  { %v422_v18 = vmul.f32 %v421_v28, %v419_v46 }
  0x89   :  { %v423_v47 = vadd.f32 %v422_v18, %v420_v29 }
  0x8b   :  { %v434_v58 = vsel %vm433_vm0, %v423_v47, 0.0 }
  0x8c   :  { %v437_v6 = vsel %vm436_vm1, %v434_v58, 0.0 }
  0x8d   :  { %438 = vadd.xlane.f32.xlu0 %v437_v6 }
 0x116   :  { %v439_v2 = vpop.xlane.xlu0 %438 }
 0x117   :  { %v440_v50 = vrot.slane %v439_v2, 4 }
 0x119   :  { %v441_v37 = vadd.f32 %v440_v50, %v439_v2 }
 0x11b   :  { %v442_v1 = vrot.slane %v441_v37, 2 }
 0x11d   :  { %v443_v51 = vadd.f32 %v442_v1, %v441_v37 }
 0x11f   :  { %v444_v5 = vrot.slane %v443_v51, 1 }
 0x121   :  { %v445_v54 = vadd.f32 %v444_v5, %v443_v51 }
 0x123   :  { %471 = vpush %v445_v54 }
 0x154   :  { %s472_s25 = spop %471 }
 0x155   :  { %v447_v20 = vstv %s472_s25 }
 0x156   :  { %448 = vst [vmem:[#allocation8] sm:$0x1] %v447_v20 }
 0x157   :  { %593 = shalt.err (!%p590_p0)
}
 0x158   :  { %458 = dma.vmem_to_hbm [thread:$0]  %s456_s24, 16, %s950_s3, [#allocation5]  }
 0x159   :  { %606 = dma.done.wait [#allocation5], 16  }
 0x15a   :  { %607 = vsyncadd [#allocation5], 4294967280 }
 0x15b   :  { %462 = vsyncpa [#allocation4], 1 }
 0x15c   :  { %463 = vsyncpa [#allocation7], 1 }
 0x15d   :  { %464 = vsyncpa [#allocation5], 1 }

</bundles_post_ra>
